<compile_context>
chip_gen: v6e
topology: v6e:2x2x1
jax: 0.10.0
libtpu: 0.0.40
codegen_flags: <defaults>
</compile_context>

<pallas_src>
import functools
import math

import jax
import jax.numpy as jnp
from jax import lax
from jax.experimental import pallas as pl
from jax.experimental.pallas import tpu as pltpu


def _table_embedding_kernel(cont_p_ref, cont_c_ref, cat_p_ref, cat_c_ref,
                            w1_ref, b1_ref, w2_ref, b2_ref, table_ref,
                            out_ref, *, offsets_p, offsets_c):
    """(TM,3)+(TM,2) cont feats and (TM,5)+(TM,2) cat ids -> (TM, 128) embedding rows."""
    cont_p = cont_p_ref[...]                    # (TM, 3)  float32
    cont_c = cont_c_ref[...]                    # (TM, 2)  float32
    tm = cont_p.shape[0]

    # ---- continuous path: first layer as rank-1 VPU accumulates over a
    # D-padded hidden (block-diagonal w1, zero-padded lanes stay zero).
    w1 = w1_ref[...]                            # (5, D)
    h = b1_ref[...]                             # (1, D) -> broadcasts to (TM, D)
    n_p_in = cont_p.shape[1]
    n_c_in = cont_c.shape[1]
    for j in range(n_p_in):
        h = h + cont_p[:, j:j + 1] * w1[j:j + 1, :]
    for j in range(n_c_in):
        h = h + cont_c[:, j:j + 1] * w1[n_p_in + j:n_p_in + j + 1, :]
    h = jnp.maximum(h, 0.0)                     # (TM, D)

    # ---- categorical path: OR-combined multi-hot over disjoint index ranges.
    V = table_ref.shape[0]
    iota_v = lax.broadcasted_iota(jnp.int32, (tm, V), 1)        # (TM, V)
    idx_p = cat_p_ref[...]                      # (TM, 5) int32
    idx_c = cat_c_ref[...]                      # (TM, 2) int32
    hot = iota_v == (idx_p[:, 0:1] + offsets_p[0])
    for c in range(1, len(offsets_p)):
        hot = jnp.logical_or(hot, iota_v == (idx_p[:, c:c + 1] + offsets_p[c]))
    for c in range(len(offsets_c)):
        hot = jnp.logical_or(hot, iota_v == (idx_c[:, c:c + 1] + offsets_c[c]))
    multi_hot = hot.astype(jnp.float32)         # (TM, V), exactly binary

    # ---- two full-width MXU matmuls accumulated into one lane-dense store.
    out = jnp.dot(multi_hot, table_ref[...], preferred_element_type=jnp.float32)
    out = out + jnp.dot(h, w2_ref[...], preferred_element_type=jnp.float32)
    out = out + b2_ref[...]
    out_ref[...] = out.astype(out_ref.dtype)


def prepare_fused_params(params, output_size=128):
    """Fold the module's weights into MXU-friendly fused operands (call ONCE)."""
    E = output_size // 4          # per-group embedding dim
    H = E                         # MLP hidden dim (== nn_dim in the module)
    D = output_size
    f32 = jnp.float32

    n_p_in = params["w1p"].shape[1]   # 3
    n_c_in = params["w1c"].shape[1]   # 2 (use_treatment=False)

    # Block-diagonal first layer, lane-padded to D: [cont_p|cont_c] -> [h_p|h_c|0].
    w1 = jnp.zeros((n_p_in + n_c_in, D), f32)
    w1 = w1.at[0:n_p_in, 0:H].set(params["w1p"].T.astype(f32))
    w1 = w1.at[n_p_in:, H:2 * H].set(params["w1c"].T.astype(f32))
    b1 = jnp.zeros((1, D), f32)
    b1 = b1.at[0, 0:H].set(params["b1p"].astype(f32))
    b1 = b1.at[0, H:2 * H].set(params["b1c"].astype(f32))

    # Second layer widened to D: cont_p_emb -> cols [2E,3E), cont_c_emb -> [3E,4E).
    w2 = jnp.zeros((D, D), f32)
    w2 = w2.at[0:H, 2 * E:3 * E].set(params["w2p"].T.astype(f32))
    w2 = w2.at[H:2 * H, 3 * E:4 * E].set(params["w2c"].T.astype(f32))
    b2 = jnp.zeros((1, D), f32)
    b2 = b2.at[0, 2 * E:3 * E].set(params["b2p"].astype(f32))
    b2 = b2.at[0, 3 * E:4 * E].set(params["b2c"].astype(f32))

    # Fused, mean-folded embedding table widened to D: all 7 vocabularies stacked
    # along rows (padded to a multiple of 128); cat_p tables (mean of 5 -> 1/5)
    # write cols [0,E), cat_c tables (mean of 2 -> 1/2) write cols [E,2E).
    tables_p = [params["tab_gender"], params["tab_korean"], params["tab_primary"],
                params["tab_job"], params["tab_rep"]]
    tables_c = [params["tab_place"], params["tab_add"]]
    v_total = sum(int(t.shape[0]) for t in tables_p + tables_c)
    v_pad = max(128, ((v_total + 127) // 128) * 128)
    table = jnp.zeros((v_pad, D), f32)
    offsets_p, offsets_c = [], []
    row = 0
    for t in tables_p:
        offsets_p.append(row)
        n = int(t.shape[0])
        table = table.at[row:row + n, 0:E].set(t.astype(f32) / float(len(tables_p)))
        row += n
    for t in tables_c:
        offsets_c.append(row)
        n = int(t.shape[0])
        table = table.at[row:row + n, E:2 * E].set(t.astype(f32) / float(len(tables_c)))
        row += n

    return {"w1": w1, "b1": b1, "w2": w2, "b2": b2, "table": table,
            "offsets_p": tuple(int(o) for o in offsets_p),
            "offsets_c": tuple(int(o) for o in offsets_c)}


def table_embedding_itrans(cont_p, cont_c, cat_p, cat_c, val_len, diff_days, fused):
    """TableEmbedding_iTrans.forward (disable_pe=True). Returns ((x, diff_days, val_len), None)."""
    B, L, Fp = cont_p.shape
    Fc = cont_c.shape[-1]
    Np = cat_p.shape[-1]
    Nc = cat_c.shape[-1]
    D = fused["w2"].shape[1]
    R = B * L

    # Pure layout plumbing (reshapes are free); no compute on the host.
    cont_p_r = cont_p.reshape(R, Fp).astype(jnp.float32)
    cont_c_r = cont_c.reshape(R, Fc).astype(jnp.float32)
    cat_p_r = cat_p.reshape(R, Np).astype(jnp.int32)
    cat_c_r = cat_c.reshape(R, Nc).astype(jnp.int32)

    # Row-tile selection: one step for small inputs, 512-row tiles otherwise
    # (near HBM roofline per measured Pallas data; well inside v7x 64 MiB VMEM).
    TM_TARGET = 512
    if R <= TM_TARGET:
        tm, rows = R, R
    else:
        tm = TM_TARGET
        rows = ((R + tm - 1) // tm) * tm
        if rows != R:
            pad = rows - R
            cont_p_r = jnp.pad(cont_p_r, ((0, pad), (0, 0)))
            cont_c_r = jnp.pad(cont_c_r, ((0, pad), (0, 0)))
            cat_p_r = jnp.pad(cat_p_r, ((0, pad), (0, 0)))
            cat_c_r = jnp.pad(cat_c_r, ((0, pad), (0, 0)))
    grid = (rows // tm,)

    kernel = functools.partial(
        _table_embedding_kernel,
        offsets_p=fused["offsets_p"], offsets_c=fused["offsets_c"])

    x_flat = pl.pallas_call(
        kernel,
        out_shape=jax.ShapeDtypeStruct((rows, D), jnp.float32),
        grid_spec=pltpu.PrefetchScalarGridSpec(
            num_scalar_prefetch=0,
            grid=grid,
            in_specs=[
                pl.BlockSpec((tm, Fp), lambda r: (r, 0)),
                pl.BlockSpec((tm, Fc), lambda r: (r, 0)),
                pl.BlockSpec((tm, Np), lambda r: (r, 0)),
                pl.BlockSpec((tm, Nc), lambda r: (r, 0)),
                pl.BlockSpec(fused["w1"].shape, lambda r: (0, 0)),
                pl.BlockSpec(fused["b1"].shape, lambda r: (0, 0)),
                pl.BlockSpec(fused["w2"].shape, lambda r: (0, 0)),
                pl.BlockSpec(fused["b2"].shape, lambda r: (0, 0)),
                pl.BlockSpec(fused["table"].shape, lambda r: (0, 0)),
            ],
            out_specs=pl.BlockSpec((tm, D), lambda r: (r, 0)),
        ),
        compiler_params=pltpu.CompilerParams(dimension_semantics=("parallel",)),
    )(cont_p_r, cont_c_r, cat_p_r, cat_c_r,
      fused["w1"], fused["b1"], fused["w2"], fused["b2"], fused["table"])

    x = x_flat[:R].reshape(B, L, D)

    # TODO(synk): disable_pe=False branch (positional_embedding add + PE(5) extra
    # output) is not implemented; the module's default config disables it.
    return (x, diff_days, val_len), None


def _reference(cont_p, cont_c, cat_p, cat_c, params):
    """Plain-JAX reference of the PyTorch forward (for correctness checking)."""
    def mlp(x, w1, b1, w2, b2):
        h = jax.nn.relu(jnp.einsum("bli,oi->blo", x, w1) + b1)
        return jnp.einsum("bli,oi->blo", h, w2) + b2

    cont_p_emb = mlp(cont_p, params["w1p"], params["b1p"], params["w2p"], params["b2p"])
    cont_c_emb = mlp(cont_c, params["w1c"], params["b1c"], params["w2c"], params["b2c"])

    lookups_p = [params["tab_gender"][cat_p[..., 0]],
                 params["tab_korean"][cat_p[..., 1]],
                 params["tab_primary"][cat_p[..., 2]],
                 params["tab_job"][cat_p[..., 3]],
                 params["tab_rep"][cat_p[..., 4]]]
    lookups_c = [params["tab_place"][cat_c[..., 0]],
                 params["tab_add"][cat_c[..., 1]]]
    cat_p_emb = jnp.mean(jnp.stack(lookups_p), axis=0)
    cat_c_emb = jnp.mean(jnp.stack(lookups_c), axis=0)
    return jnp.concatenate([cat_p_emb, cat_c_emb, cont_p_emb, cont_c_emb], axis=-1)


def _init_params(key, output_size=128, use_treatment=False):
    """Deterministic init mimicking nn.Linear / nn.Embedding defaults (shapes only matter)."""
    E = output_size // 4
    H = E
    n_cont_c = 1 if use_treatment else 2
    keys = jax.random.split(key, 11)

    def lin(k, out_f, in_f):
        bound = 1.0 / math.sqrt(in_f)
        kw, kb = jax.random.split(k)
        w = jax.random.uniform(kw, (out_f, in_f), jnp.float32, -bound, bound)
        b = jax.random.uniform(kb, (out_f,), jnp.float32, -bound, bound)
        return w, b

    def emb(k, n, d):
        return jax.random.normal(k, (n, d), dtype=jnp.float32)

    params = {}
    params["w1p"], params["b1p"] = lin(keys[0], H, 3)
    params["w2p"], params["b2p"] = lin(keys[1], E, H)
    params["w1c"], params["b1c"] = lin(keys[2], H, n_cont_c)
    params["w2c"], params["b2c"] = lin(keys[3], E, H)
    params["tab_gender"] = emb(keys[4], 2, E)
    params["tab_korean"] = emb(keys[5], 2, E)
    params["tab_primary"] = emb(keys[6], 2, E)
    params["tab_job"] = emb(keys[7], 11, E)
    params["tab_rep"] = emb(keys[8], 34, E)
    params["tab_place"] = emb(keys[9], 19, E)
    params["tab_add"] = emb(keys[10], 31, E)
    return params


if __name__ == "__main__":
    B, L, output_size = 2, 8, 128

    key = jax.random.PRNGKey(0)
    k = jax.random.split(key, 10)
    cont_p = jax.random.normal(k[0], (B, L, 3), dtype=jnp.float32)
    cont_c = jax.random.normal(k[1], (B, L, 2), dtype=jnp.float32)
    cat_p = jnp.stack([
        jax.random.randint(k[2], (B, L), 0, 2),
        jax.random.randint(k[3], (B, L), 0, 2),
        jax.random.randint(k[4], (B, L), 0, 2),
        jax.random.randint(k[5], (B, L), 0, 11),
        jax.random.randint(k[6], (B, L), 0, 34),
    ], axis=-1)
    cat_c = jnp.stack([
        jax.random.randint(k[7], (B, L), 0, 19),
        jax.random.randint(k[8], (B, L), 0, 31),
    ], axis=-1)
    val_len = jnp.full((B,), L, dtype=jnp.int32)
    diff_days = jax.random.normal(k[9], (B, L, 1), dtype=jnp.float32)

    params = _init_params(jax.random.PRNGKey(42), output_size)
    fused = prepare_fused_params(params, output_size)   # once, outside the hot path

    (x, dd, vl), pe = table_embedding_itrans(
        cont_p, cont_c, cat_p, cat_c, val_len, diff_days, fused)
    x = jax.block_until_ready(x)

    ref = _reference(cont_p, cont_c, cat_p, cat_c, params)
    assert x.shape == (B, L, output_size)
    assert pe is None
    assert dd.shape == diff_days.shape and vl.shape == val_len.shape
    # Tolerance covers possible bf16 MXU passes at default matmul precision.
    assert jnp.allclose(x, ref, atol=1e-2, rtol=1e-2), "mismatch vs reference"

    print("KERNEL_OK")
</pallas_src>

<mosaic_0001>
module attributes {stable_mosaic.version = 11 : i64} {
  func.func @_table_embedding_kernel(%arg0: i32, %arg1: memref<16x3xf32, #tpu.memory_space<vmem>>, %arg2: memref<16x2xf32, #tpu.memory_space<vmem>>, %arg3: memref<16x5xi32, #tpu.memory_space<vmem>>, %arg4: memref<16x2xi32, #tpu.memory_space<vmem>>, %arg5: memref<5x128xf32, #tpu.memory_space<vmem>>, %arg6: memref<1x128xf32, #tpu.memory_space<vmem>>, %arg7: memref<128x128xf32, #tpu.memory_space<vmem>>, %arg8: memref<1x128xf32, #tpu.memory_space<vmem>>, %arg9: memref<128x128xf32, #tpu.memory_space<vmem>>, %arg10: memref<16x128xf32, #tpu.memory_space<vmem>>) attributes {dimension_semantics = [#tpu.dimension_semantics<parallel>], iteration_bounds = array<i64: 1>, scalar_prefetch = 0 : i64, scratch_operands = 0 : i64, tpu.core_type = #tpu.core_type<tc>, window_params = [{transform_indices = @transform_0, window_bounds = array<i64: 16, 3>}, {transform_indices = @transform_1, window_bounds = array<i64: 16, 2>}, {transform_indices = @transform_2, window_bounds = array<i64: 16, 5>}, {transform_indices = @transform_3, window_bounds = array<i64: 16, 2>}, {pipeline_mode = #tpu.pipeline_mode<synchronous>, transform_indices = @transform_4, window_bounds = array<i64: 5, 128>}, {pipeline_mode = #tpu.pipeline_mode<synchronous>, transform_indices = @transform_5, window_bounds = array<i64: 1, 128>}, {pipeline_mode = #tpu.pipeline_mode<synchronous>, transform_indices = @transform_6, window_bounds = array<i64: 128, 128>}, {pipeline_mode = #tpu.pipeline_mode<synchronous>, transform_indices = @transform_7, window_bounds = array<i64: 1, 128>}, {pipeline_mode = #tpu.pipeline_mode<synchronous>, transform_indices = @transform_8, window_bounds = array<i64: 128, 128>}, {transform_indices = @transform_9, window_bounds = array<i64: 16, 128>}]} {
    %c0 = arith.constant 0 : index
    %c0_0 = arith.constant 0 : index
    %0 = vector.load %arg1[%c0, %c0_0] : memref<16x3xf32, #tpu.memory_space<vmem>>, vector<16x3xf32>
    %c0_1 = arith.constant 0 : index
    %c0_2 = arith.constant 0 : index
    %1 = vector.load %arg2[%c0_1, %c0_2] : memref<16x2xf32, #tpu.memory_space<vmem>>, vector<16x2xf32>
    %c0_3 = arith.constant 0 : index
    %c0_4 = arith.constant 0 : index
    %2 = vector.load %arg5[%c0_3, %c0_4] : memref<5x128xf32, #tpu.memory_space<vmem>>, vector<5x128xf32>
    %c0_5 = arith.constant 0 : index
    %c0_6 = arith.constant 0 : index
    %3 = vector.load %arg6[%c0_5, %c0_6] : memref<1x128xf32, #tpu.memory_space<vmem>>, vector<1x128xf32>
    %4 = vector.extract_strided_slice %0 {offsets = [0, 0], sizes = [16, 1], strides = [1, 1]} : vector<16x3xf32> to vector<16x1xf32>
    %5 = vector.extract_strided_slice %2 {offsets = [0, 0], sizes = [1, 128], strides = [1, 1]} : vector<5x128xf32> to vector<1x128xf32>
    %6 = vector.broadcast %4 : vector<16x1xf32> to vector<16x128xf32>
    %7 = vector.broadcast %5 : vector<1x128xf32> to vector<16x128xf32>
    %8 = arith.mulf %6, %7 : vector<16x128xf32>
    %9 = vector.broadcast %3 : vector<1x128xf32> to vector<16x128xf32>
    %10 = arith.addf %9, %8 : vector<16x128xf32>
    %11 = vector.extract_strided_slice %0 {offsets = [0, 1], sizes = [16, 1], strides = [1, 1]} : vector<16x3xf32> to vector<16x1xf32>
    %12 = vector.extract_strided_slice %2 {offsets = [1, 0], sizes = [1, 128], strides = [1, 1]} : vector<5x128xf32> to vector<1x128xf32>
    %13 = vector.broadcast %11 : vector<16x1xf32> to vector<16x128xf32>
    %14 = vector.broadcast %12 : vector<1x128xf32> to vector<16x128xf32>
    %15 = arith.mulf %13, %14 : vector<16x128xf32>
    %16 = arith.addf %10, %15 : vector<16x128xf32>
    %17 = vector.extract_strided_slice %0 {offsets = [0, 2], sizes = [16, 1], strides = [1, 1]} : vector<16x3xf32> to vector<16x1xf32>
    %18 = vector.extract_strided_slice %2 {offsets = [2, 0], sizes = [1, 128], strides = [1, 1]} : vector<5x128xf32> to vector<1x128xf32>
    %19 = vector.broadcast %17 : vector<16x1xf32> to vector<16x128xf32>
    %20 = vector.broadcast %18 : vector<1x128xf32> to vector<16x128xf32>
    %21 = arith.mulf %19, %20 : vector<16x128xf32>
    %22 = arith.addf %16, %21 : vector<16x128xf32>
    %23 = vector.extract_strided_slice %1 {offsets = [0, 0], sizes = [16, 1], strides = [1, 1]} : vector<16x2xf32> to vector<16x1xf32>
    %24 = vector.extract_strided_slice %2 {offsets = [3, 0], sizes = [1, 128], strides = [1, 1]} : vector<5x128xf32> to vector<1x128xf32>
    %25 = vector.broadcast %23 : vector<16x1xf32> to vector<16x128xf32>
    %26 = vector.broadcast %24 : vector<1x128xf32> to vector<16x128xf32>
    %27 = arith.mulf %25, %26 : vector<16x128xf32>
    %28 = arith.addf %22, %27 : vector<16x128xf32>
    %29 = vector.extract_strided_slice %1 {offsets = [0, 1], sizes = [16, 1], strides = [1, 1]} : vector<16x2xf32> to vector<16x1xf32>
    %30 = vector.extract_strided_slice %2 {offsets = [4, 0], sizes = [1, 128], strides = [1, 1]} : vector<5x128xf32> to vector<1x128xf32>
    %31 = vector.broadcast %29 : vector<16x1xf32> to vector<16x128xf32>
    %32 = vector.broadcast %30 : vector<1x128xf32> to vector<16x128xf32>
    %33 = arith.mulf %31, %32 : vector<16x128xf32>
    %34 = arith.addf %28, %33 : vector<16x128xf32>
    %cst = arith.constant 0.000000e+00 : f32
    %35 = vector.broadcast %cst : f32 to vector<16x128xf32>
    %36 = arith.maximumf %34, %35 : vector<16x128xf32>
    %37 = tpu.iota {dimensions = array<i32: 1>} : vector<16x128xi32>
    %c0_7 = arith.constant 0 : index
    %c0_8 = arith.constant 0 : index
    %38 = vector.load %arg3[%c0_7, %c0_8] : memref<16x5xi32, #tpu.memory_space<vmem>>, vector<16x5xi32>
    %c0_9 = arith.constant 0 : index
    %c0_10 = arith.constant 0 : index
    %39 = vector.load %arg4[%c0_9, %c0_10] : memref<16x2xi32, #tpu.memory_space<vmem>>, vector<16x2xi32>
    %40 = vector.extract_strided_slice %38 {offsets = [0, 0], sizes = [16, 1], strides = [1, 1]} : vector<16x5xi32> to vector<16x1xi32>
    %c0_i32 = arith.constant 0 : i32
    %41 = vector.broadcast %c0_i32 : i32 to vector<16x1xi32>
    %42 = arith.addi %40, %41 : vector<16x1xi32>
    %43 = vector.broadcast %42 : vector<16x1xi32> to vector<16x128xi32>
    %44 = arith.cmpi eq, %37, %43 : vector<16x128xi32>
    %45 = vector.extract_strided_slice %38 {offsets = [0, 1], sizes = [16, 1], strides = [1, 1]} : vector<16x5xi32> to vector<16x1xi32>
    %c2_i32 = arith.constant 2 : i32
    %46 = vector.broadcast %c2_i32 : i32 to vector<16x1xi32>
    %47 = arith.addi %45, %46 : vector<16x1xi32>
    %48 = vector.broadcast %47 : vector<16x1xi32> to vector<16x128xi32>
    %49 = arith.cmpi eq, %37, %48 : vector<16x128xi32>
    %50 = arith.ori %44, %49 : vector<16x128xi1>
    %51 = vector.extract_strided_slice %38 {offsets = [0, 2], sizes = [16, 1], strides = [1, 1]} : vector<16x5xi32> to vector<16x1xi32>
    %c4_i32 = arith.constant 4 : i32
    %52 = vector.broadcast %c4_i32 : i32 to vector<16x1xi32>
    %53 = arith.addi %51, %52 : vector<16x1xi32>
    %54 = vector.broadcast %53 : vector<16x1xi32> to vector<16x128xi32>
    %55 = arith.cmpi eq, %37, %54 : vector<16x128xi32>
    %56 = arith.ori %50, %55 : vector<16x128xi1>
    %57 = vector.extract_strided_slice %38 {offsets = [0, 3], sizes = [16, 1], strides = [1, 1]} : vector<16x5xi32> to vector<16x1xi32>
    %c6_i32 = arith.constant 6 : i32
    %58 = vector.broadcast %c6_i32 : i32 to vector<16x1xi32>
    %59 = arith.addi %57, %58 : vector<16x1xi32>
    %60 = vector.broadcast %59 : vector<16x1xi32> to vector<16x128xi32>
    %61 = arith.cmpi eq, %37, %60 : vector<16x128xi32>
    %62 = arith.ori %56, %61 : vector<16x128xi1>
    %63 = vector.extract_strided_slice %38 {offsets = [0, 4], sizes = [16, 1], strides = [1, 1]} : vector<16x5xi32> to vector<16x1xi32>
    %c17_i32 = arith.constant 17 : i32
    %64 = vector.broadcast %c17_i32 : i32 to vector<16x1xi32>
    %65 = arith.addi %63, %64 : vector<16x1xi32>
    %66 = vector.broadcast %65 : vector<16x1xi32> to vector<16x128xi32>
    %67 = arith.cmpi eq, %37, %66 : vector<16x128xi32>
    %68 = arith.ori %62, %67 : vector<16x128xi1>
    %69 = vector.extract_strided_slice %39 {offsets = [0, 0], sizes = [16, 1], strides = [1, 1]} : vector<16x2xi32> to vector<16x1xi32>
    %c51_i32 = arith.constant 51 : i32
    %70 = vector.broadcast %c51_i32 : i32 to vector<16x1xi32>
    %71 = arith.addi %69, %70 : vector<16x1xi32>
    %72 = vector.broadcast %71 : vector<16x1xi32> to vector<16x128xi32>
    %73 = arith.cmpi eq, %37, %72 : vector<16x128xi32>
    %74 = arith.ori %68, %73 : vector<16x128xi1>
    %75 = vector.extract_strided_slice %39 {offsets = [0, 1], sizes = [16, 1], strides = [1, 1]} : vector<16x2xi32> to vector<16x1xi32>
    %c70_i32 = arith.constant 70 : i32
    %76 = vector.broadcast %c70_i32 : i32 to vector<16x1xi32>
    %77 = arith.addi %75, %76 : vector<16x1xi32>
    %78 = vector.broadcast %77 : vector<16x1xi32> to vector<16x128xi32>
    %79 = arith.cmpi eq, %37, %78 : vector<16x128xi32>
    %80 = arith.ori %74, %79 : vector<16x128xi1>
    %81 = arith.extui %80 : vector<16x128xi1> to vector<16x128xi32>
    %82 = arith.sitofp %81 : vector<16x128xi32> to vector<16x128xf32>
    %c0_11 = arith.constant 0 : index
    %c0_12 = arith.constant 0 : index
    %83 = vector.load %arg9[%c0_11, %c0_12] : memref<128x128xf32, #tpu.memory_space<vmem>>, vector<128x128xf32>
    %cst_13 = arith.constant dense<0.000000e+00> : vector<16x128xf32>
    %84 = tpu.matmul %82, %83, %cst_13 {dimension_numbers = #tpu.dot_dimension_numbers<[1], [0], [0], [1], [0, 0, 1, 1], [], []>} : vector<16x128xf32>, vector<128x128xf32>, vector<16x128xf32> -> vector<16x128xf32>
    %c0_14 = arith.constant 0 : index
    %c0_15 = arith.constant 0 : index
    %85 = vector.load %arg7[%c0_14, %c0_15] : memref<128x128xf32, #tpu.memory_space<vmem>>, vector<128x128xf32>
    %cst_16 = arith.constant dense<0.000000e+00> : vector<16x128xf32>
    %86 = tpu.matmul %36, %85, %cst_16 {dimension_numbers = #tpu.dot_dimension_numbers<[1], [0], [0], [1], [0, 0, 1, 1], [], []>} : vector<16x128xf32>, vector<128x128xf32>, vector<16x128xf32> -> vector<16x128xf32>
    %87 = arith.addf %84, %86 : vector<16x128xf32>
    %c0_17 = arith.constant 0 : index
    %c0_18 = arith.constant 0 : index
    %88 = vector.load %arg8[%c0_17, %c0_18] : memref<1x128xf32, #tpu.memory_space<vmem>>, vector<1x128xf32>
    %89 = vector.broadcast %88 : vector<1x128xf32> to vector<16x128xf32>
    %90 = arith.addf %87, %89 : vector<16x128xf32>
    %c0_19 = arith.constant 0 : index
    %c0_20 = arith.constant 0 : index
    %91 = vector.load %arg10[%c0_19, %c0_20] : memref<16x128xf32, #tpu.memory_space<vmem>>, vector<16x128xf32>
    tpu.vector_store %arg10[%c0_19, %c0_20], %90 {strides = array<i32>} : memref<16x128xf32, #tpu.memory_space<vmem>>, vector<16x128xf32>,
    return
  }
  func.func @transform_0(%arg0: i32) -> (i32, i32) {
    %c0_i32 = arith.constant 0 : i32
    %c0_i32_0 = arith.constant 0 : i32
    return %arg0, %c0_i32 : i32, i32
  }
  func.func @transform_1(%arg0: i32) -> (i32, i32) {
    %c0_i32 = arith.constant 0 : i32
    %c0_i32_0 = arith.constant 0 : i32
    return %arg0, %c0_i32 : i32, i32
  }
  func.func @transform_2(%arg0: i32) -> (i32, i32) {
    %c0_i32 = arith.constant 0 : i32
    %c0_i32_0 = arith.constant 0 : i32
    return %arg0, %c0_i32 : i32, i32
  }
  func.func @transform_3(%arg0: i32) -> (i32, i32) {
    %c0_i32 = arith.constant 0 : i32
    %c0_i32_0 = arith.constant 0 : i32
    return %arg0, %c0_i32 : i32, i32
  }
  func.func @transform_4(%arg0: i32) -> (i32, i32) {
    %c0_i32 = arith.constant 0 : i32
    %c0_i32_0 = arith.constant 0 : i32
    %c0_i32_1 = arith.constant 0 : i32
    return %c0_i32, %c0_i32_0 : i32, i32
  }
  func.func @transform_5(%arg0: i32) -> (i32, i32) {
    %c0_i32 = arith.constant 0 : i32
    %c0_i32_0 = arith.constant 0 : i32
    %c0_i32_1 = arith.constant 0 : i32
    return %c0_i32, %c0_i32_0 : i32, i32
  }
  func.func @transform_6(%arg0: i32) -> (i32, i32) {
    %c0_i32 = arith.constant 0 : i32
    %c0_i32_0 = arith.constant 0 : i32
    %c0_i32_1 = arith.constant 0 : i32
    return %c0_i32, %c0_i32_0 : i32, i32
  }
  func.func @transform_7(%arg0: i32) -> (i32, i32) {
    %c0_i32 = arith.constant 0 : i32
    %c0_i32_0 = arith.constant 0 : i32
    %c0_i32_1 = arith.constant 0 : i32
    return %c0_i32, %c0_i32_0 : i32, i32
  }
  func.func @transform_8(%arg0: i32) -> (i32, i32) {
    %c0_i32 = arith.constant 0 : i32
    %c0_i32_0 = arith.constant 0 : i32
    %c0_i32_1 = arith.constant 0 : i32
    return %c0_i32, %c0_i32_0 : i32, i32
  }
  func.func @transform_9(%arg0: i32) -> (i32, i32) {
    %c0_i32 = arith.constant 0 : i32
    %c0_i32_0 = arith.constant 0 : i32
    return %arg0, %c0_i32 : i32, i32
  }
}

</mosaic_0001>

<bundles_post_ra>
// kernel: tpu_custom_call.1
= control target key start
LH: loop header
LB: loop body
LE: loop exit
PB: predicated region body
PF: predicated region fallthrough
CT: control target
= control target key end

     0   :  { %14 = vsyncpa [#allocation3], 0  ;;  %s804_s0 = inlined_call_operand.vmem [shape: f32[16,3], index: 0, kind: input, shape index: {}]   ;;  %s805_s1 = inlined_call_operand.vmem [shape: f32[16,2], index: 1, kind: input, shape index: {}]   ;;  %s806_s2 = inlined_call_operand.vmem [shape: s32[16,5], index: 2, kind: input, shape index: {}]   ;;  %s807_s3 = inlined_call_operand.vmem [shape: s32[16,2], index: 3, kind: input, shape index: {}]   ;;  %s808_s4 = inlined_call_operand.vmem [shape: f32[5,128], index: 4, kind: input, shape index: {}]   ;;  %s809_s5 = inlined_call_operand.vmem [shape: f32[1,128], index: 5, kind: input, shape index: {}]   ;;  %s810_s6 = inlined_call_operand.hbm [shape: f32[128,128], index: 6, kind: input, shape index: {}]   ;;  %s811_s7 = inlined_call_operand.vmem [shape: f32[1,128], index: 7, kind: input, shape index: {}]   ;;  %s812_s8 = inlined_call_operand.hbm [shape: f32[128,128], index: 8, kind: input, shape index: {}]   ;;  %s813_s9 = inlined_call_operand.hbm [shape: f32[16,128], index: 9, kind: output, shape index: {}]  }
   0x1   :  { %15 = vsyncpa [#allocation6], 0 }
   0x2   :  { %16 = vsyncpa [#allocation4], 0  ;;  %s664_s30 = smov [#allocation2]  }
   0x3   :  { %s34_s10 = sshll.u32 %s664_s30, 4  ;;  %s35_s10 = int_to_ptr.vmem [resolvable:$true] %s34_s10 }
   0x4   :  { %s606_s11 = scalar_lea.vmem %s35_s10, 2048  ;;  %p611_p1 = scmp.lt.s32.totalorder %s35_s10, %s35_s10 }
   0x5   :  { %p607_p0 = scmp.ne.s32.totalorder %s35_s10, %s606_s11  ;;  %p612_p2 = scmp.lt.s32.totalorder %s606_s11, %s606_s11 }
   0x7   :  { %p613_p3 = por %p612_p2, %p611_p1 }
   0x9   :  { %p614_p4 = pnand %p613_p3, %p607_p0 }
   0xb   :  { %617 = shalt.err (!%p614_p4)
}
   0xc   :  { %s665_s12 = smov 128   ;;  %s666_s13 = smov 8  }
   0xd   :  { %40 = dma.hbm_to_vmem [thread:$0]  %s810_s6, 2048, %s35_s10, [#allocation3], %s665_s12, %s665_s12, %s666_s13  }
   0xe   :  { %s667_s16 = smov [#allocation5]  }
   0xf   :  { %s48_s17 = sshll.u32 %s667_s16, 4  ;;  %s49_s17 = int_to_ptr.vmem [resolvable:$true] %s48_s17 }
  0x10   :  { %s626_s18 = scalar_lea.vmem %s49_s17, 2048  ;;  %p631_p6 = scmp.lt.s32.totalorder %s49_s17, %s49_s17 }
  0x11   :  { %p627_p5 = scmp.ne.s32.totalorder %s49_s17, %s626_s18  ;;  %p632_p7 = scmp.lt.s32.totalorder %s626_s18, %s626_s18 }
  0x13   :  { %p633_p8 = por %p632_p7, %p631_p6 }
  0x15   :  { %p634_p9 = pnand %p633_p8, %p627_p5 }
  0x17   :  { %637 = shalt.err (!%p634_p9)
}
  0x18   :  { %54 = dma.hbm_to_vmem [thread:$0]  %s812_s8, 2048, %s49_s17, [#allocation6], %s665_s12, %s665_s12, %s666_s13  }
  0x19   :  { %658 = dma.done.wait [#allocation3], 2048  }
  0x1a   :  { %659 = vsyncadd [#allocation3], 4294965248 }
  0x1b   :  { %660 = dma.done.wait [#allocation6], 2048  }
  0x1c   :  { %661 = vsyncadd [#allocation6], 4294965248  ;;  %v668_v0 = vmov 2   ;;  %v669_v1 = vmov 1   ;;  %v61_v2 = vld [vmem:[%s804_s0] sm:$0xff]  ;;  %v62_v5 = vld [vmem:[%s804_s0 + $0x8] sm:$0xff]  ;;  %v77_v61 = vlaneseq }
  0x1d   :  { %582 = vset.pattern.permute.xlu0 %v668_v0  ;;  %581 = vset.pattern.permute.xlu1 %v669_v1  ;;  %v161_v3 = vld [vmem:[%s806_s2] sm:$0xff]  ;;  %v670_v7 = vmov 3   ;;  %v280_v9 = vld [vmem:[#allocation2 + $0x78] sm:$0xff]  ;;  %v671_v11 = vmov 4   ;;  %v672_v12 = vmov 0   ;;  %v279_v13 = vld [vmem:[#allocation2 + $0x70] sm:$0xff] }
  0x1e   :  { %108 = vperm.xlu0 %582, %v61_v2   ;;  %92 = vperm.xlu1 %581, %v61_v2   ;;  %v185_v4 = vadd.s32 4, %v161_v3  ;;  %v197_v6 = vadd.s32 6, %v161_v3  ;;  %v209_v8 = vadd.s32 17, %v161_v3  ;;  %v63_v10 = vld [vmem:[%s805_s1] sm:$0xff]  ;;  %v173_v14 = vadd.s32 2, %v161_v3  ;;  %v278_v15 = vld [vmem:[#allocation2 + $0x68] sm:$0xff] }
  0x1f   :  { %500 = vmatprep.subr.mxu0 %v280_v9  ;;  %v277_v16 = vld [vmem:[#allocation2 + $0x60] sm:$0xff]  ;;  %v64_v17 = vld [vmem:[%s805_s1 + $0x8] sm:$0xff]  ;;  %v276_v18 = vld [vmem:[#allocation2 + $0x58] sm:$0xff]  ;;  %s674_s16 = smov [#allocation7]  }
  0x20   :  { %501 = vmatpush3.msra.mxu0 %v280_v9  ;;  %v763_v19 = vld [vmem:[%s806_s2 + $0x8] sm:$0xff]  ;;  %v275_v20 = vld [vmem:[#allocation2 + $0x50] sm:$0xff]  ;;  %v273_v23 = vld [vmem:[#allocation2 + $0x40] sm:$0xff]  ;;  %s447_s17 = sshll.u32 %s674_s16, 4  ;;  %s448_s17 = int_to_ptr.vmem [resolvable:$true] %s447_s17 }
  0x21   :  { %502 = vmatprep.subr.mxu0 %v279_v13  ;;  %v174_v21 = vadd.s32 2, %v763_v19  ;;  %v274_v22 = vld [vmem:[#allocation2 + $0x48] sm:$0xff]  ;;  %v272_v25 = vld [vmem:[#allocation2 + $0x38] sm:$0xff]  ;;  %v271_v27 = vld [vmem:[#allocation2 + $0x30] sm:$0xff]  ;;  %v186_v30 = vadd.s32 4, %v763_v19  ;;  %v198_v39 = vadd.s32 6, %v763_v19  ;;  %p643_p11 = scmp.lt.s32.totalorder %s448_s17, %s448_s17 }
  0x22   :  { %188 = vperm.xlu0 %582, %v185_v4   ;;  %96 = vperm.xlu1 %581, %v62_v5   ;;  %v771_v24 = vld [vmem:[%s807_s3 + $0x8] sm:$0xff]  ;;  %v264_v29 = vld [vmem:[#allocation5 + $0x78] sm:$0xff]  ;;  %v269_v31 = vld [vmem:[#allocation2 + $0x20] sm:$0xff]  ;;  %v210_v43 = vadd.s32 17, %v763_v19  ;;  %s638_s18 = scalar_lea.vmem %s448_s17, 256 }
  0x23   :  { %503 = vmatpush3.msra.mxu0 %v279_v13  ;;  %v222_v26 = vadd.s32 51, %v771_v24  ;;  %v270_v28 = vld [vmem:[#allocation2 + $0x28] sm:$0xff]  ;;  %535 = vmatprep.subr.mxu1 %v264_v29  ;;  %v263_v32 = vld [vmem:[#allocation5 + $0x70] sm:$0xff]  ;;  %v268_v33 = vld [vmem:[#allocation2 + $0x18] sm:$0xff]  ;;  %v234_v54 = vadd.s32 70, %v771_v24  ;;  %p639_p10 = scmp.ne.s32.totalorder %s448_s17, %s638_s18  ;;  %p644_p12 = scmp.lt.s32.totalorder %s638_s18, %s638_s18 }
  0x24   :  { %504 = vmatprep.subr.mxu0 %v278_v15  ;;  %536 = vmatpush3.msra.mxu1 %v264_v29  ;;  %v262_v34 = vld [vmem:[#allocation5 + $0x68] sm:$0xff]  ;;  %v267_v35 = vld [vmem:[#allocation2 + $0x10] sm:$0xff]  ;;  %v261_v36 = vld [vmem:[#allocation5 + $0x60] sm:$0xff] }
  0x25   :  { %505 = vmatpush3.msra.mxu0 %v278_v15  ;;  %537 = vmatprep.subr.mxu1 %v263_v32  ;;  %v266_v37 = vld [vmem:[#allocation2 + $0x8] sm:$0xff]  ;;  %v260_v38 = vld [vmem:[#allocation5 + $0x58] sm:$0xff]  ;;  %v265_v40 = vld [vmem:[#allocation2] sm:$0xff]  ;;  %p645_p13 = por %p644_p12, %p643_p11 }
  0x26   :  { %589 = vset.pattern.permute.xlu0 %v670_v7  ;;  %583 = vset.pattern.permute.xlu1 %v668_v0  ;;  %v259_v41 = vld [vmem:[#allocation5 + $0x50] sm:$0xff]  ;;  %v258_v42 = vld [vmem:[#allocation5 + $0x48] sm:$0xff]  ;;  %v257_v44 = vld [vmem:[#allocation5 + $0x40] sm:$0xff] }
  0x27   :  { %200 = vperm.xlu0 %589, %v197_v6   ;;  %112 = vperm.xlu1 %583, %v62_v5   ;;  %v163_v45 = vld [vmem:[%s807_s3] sm:$0xff]  ;;  %v256_v46 = vld [vmem:[#allocation5 + $0x38] sm:$0xff]  ;;  %v255_v48 = vld [vmem:[#allocation5 + $0x30] sm:$0xff]  ;;  %p646_p0 = pnand %p645_p13, %p639_p10 }
  0x28   :  { %506 = vmatprep.subr.mxu0 %v277_v16  ;;  %538 = vmatpush3.msra.mxu1 %v263_v32  ;;  %v221_v47 = vadd.s32 51, %v163_v45  ;;  %v254_v49 = vld [vmem:[#allocation5 + $0x28] sm:$0xff]  ;;  %v253_v50 = vld [vmem:[#allocation5 + $0x20] sm:$0xff]  ;;  %v233_v51 = vadd.s32 70, %v163_v45  ;;  %v252_v52 = vld [vmem:[#allocation5 + $0x18] sm:$0xff] }
  0x29   :  { %507 = vmatpush3.msra.mxu0 %v277_v16  ;;  %539 = vmatprep.subr.mxu1 %v262_v34  ;;  %v251_v53 = vld [vmem:[#allocation5 + $0x10] sm:$0xff]  ;;  %v250_v55 = vld [vmem:[#allocation5 + $0x8] sm:$0xff]  ;;  %v249_v56 = vld [vmem:[#allocation5] sm:$0xff] }
  0x2a   :  { %508 = vmatprep.subr.mxu0 %v276_v18  ;;  %540 = vmatpush3.msra.mxu1 %v262_v34  ;;  %v65_v4 = vld [vmem:[%s808_s4] sm:$0x1f] }
  0x2b   :  { %592 = vset.pattern.permute.xlu0 %v671_v11  ;;  %584 = vset.pattern.permute.xlu1 %v672_v12 }
  0x2c   :  { %212 = vperm.xlu0 %592, %v209_v8   ;;  %125 = vperm.xlu1 %584, %v63_v10  }
  0x2d   :  { %509 = vmatpush3.msra.mxu0 %v276_v18  ;;  %541 = vmatprep.subr.mxu1 %v261_v36 }
  0x2e   :  { %510 = vmatprep.subr.mxu0 %v275_v20  ;;  %542 = vmatpush3.msra.mxu1 %v261_v36 }
  0x2f   :  { %511 = vmatpush3.msra.mxu0 %v275_v20  ;;  %543 = vmatprep.subr.mxu1 %v260_v38 }
  0x30   :  { %593 = vset.pattern.permute.xlu0 %v672_v12  ;;  %585 = vset.pattern.permute.xlu1 %v669_v1 }
  0x31   :  { %69 = vperm.xlu0 %593, %v61_v2   ;;  %176 = vperm.xlu1 %585, %v173_v14  }
  0x32   :  { %512 = vmatprep.subr.mxu0 %v274_v22  ;;  %544 = vmatpush3.msra.mxu1 %v260_v38 }
  0x33   :  { %513 = vmatpush3.msra.mxu0 %v274_v22  ;;  %545 = vmatprep.subr.mxu1 %v259_v41 }
  0x34   :  { %514 = vmatprep.subr.mxu0 %v273_v23  ;;  %546 = vmatpush3.msra.mxu1 %v259_v41 }
  0x35   :  { %74 = vperm.xlu0 %593, %v62_v5   ;;  %586 = vset.pattern.permute.xlu1 %v672_v12 }
  0x36   :  { %130 = vperm.xlu1 %586, %v64_v17   ;;  %515 = vmatpush3.msra.mxu0 %v273_v23 }
  0x37   :  { %516 = vmatprep.subr.mxu0 %v272_v25  ;;  %547 = vmatprep.subr.mxu1 %v258_v42 }
  0x38   :  { %517 = vmatpush3.msra.mxu0 %v272_v25  ;;  %548 = vmatpush3.msra.mxu1 %v258_v42 }
  0x39   :  { %166 = vperm.xlu0 %593, %v161_v3   ;;  %518 = vmatprep.subr.mxu0 %v271_v27 }
  0x3a   :  { %587 = vset.pattern.permute.xlu1 %v669_v1  ;;  %519 = vmatpush3.msra.mxu0 %v271_v27 }
  0x3b   :  { %179 = vperm.xlu1 %587, %v174_v21   ;;  %520 = vmatprep.subr.mxu0 %v270_v28 }
  0x3c   :  { %521 = vmatpush3.msra.mxu0 %v270_v28  ;;  %549 = vmatprep.subr.mxu1 %v257_v44 }
  0x3d   :  { %169 = vperm.xlu0 %593, %v763_v19   ;;  %522 = vmatprep.subr.mxu0 %v269_v31 }
  0x3e   :  { %523 = vmatpush3.msra.mxu0 %v269_v31  ;;  %550 = vmatpush3.msra.mxu1 %v257_v44  ;;  %v160_v44 = vand.u32 127, %v77_v61 }
  0x3f   :  { %142 = vperm.xlu1 %587, %v63_v10   ;;  %524 = vmatprep.subr.mxu0 %v268_v33 }
  0x40   :  { %525 = vmatpush3.msra.mxu0 %v268_v33  ;;  %551 = vmatprep.subr.mxu1 %v256_v46 }
  0x41   :  { %227 = vperm.xlu0 %593, %v222_v26   ;;  %526 = vmatprep.subr.mxu0 %v267_v35 }
  0x42   :  { %527 = vmatpush3.msra.mxu0 %v267_v35  ;;  %552 = vmatpush3.msra.mxu1 %v256_v46 }
  0x43   :  { %588 = vset.pattern.permute.xlu1 %v668_v0  ;;  %528 = vmatprep.subr.mxu0 %v266_v37  ;;  %v78_v0 = vshrl.u32 %v77_v61, 7 }
  0x44   :  { %191 = vperm.xlu1 %588, %v186_v30   ;;  %529 = vmatpush3.msra.mxu0 %v266_v37 }
  0x45   :  { %530 = vmatprep.subr.mxu0 %v265_v40  ;;  %597 = vset.pattern.permute.xlu0 %v669_v1  ;;  %v101_v5 = vsub.s32 1, %v78_v0  ;;  %v135_v16 = vsub.s32 3, %v78_v0  ;;  %v151_v21 = vsub.s32 4, %v78_v0 }
  0x46   :  { %531 = vmatpush3.msra.mxu0 %v265_v40  ;;  %553 = vmatprep.subr.mxu1 %v255_v48 }
  0x47   :  { %554 = vmatpush3.msra.mxu1 %v255_v48  ;;  %v102_v10 = vrot.slane %v65_v4, %v101_v5  ;;  %v136_v22 = vrot.slane %v65_v4, %v135_v16  ;;  %v152_v25 = vrot.slane %v65_v4, %v151_v21 }
  0x48   :  { %590 = vset.pattern.permute.xlu1 %v669_v1  ;;  %555 = vmatprep.subr.mxu1 %v254_v49 }
  0x49   :  { %146 = vperm.xlu1 %590, %v64_v17   ;;  %556 = vmatpush3.msra.mxu1 %v254_v49 }
  0x4a   :  { %557 = vmatprep.subr.mxu1 %v253_v50 }
  0x4b   :  { %558 = vmatpush3.msra.mxu1 %v253_v50 }
  0x4c   :  { %559 = vmatprep.subr.mxu1 %v252_v52 }
  0x4d   :  { %591 = vset.pattern.permute.xlu1 %v670_v7  ;;  %560 = vmatpush3.msra.mxu1 %v252_v52  ;;  %v460_v7 = vld [vmem:[%s809_s5] ss:$0 sm:$0xff] }
  0x4e   :  { %203 = vperm.xlu1 %591, %v198_v39   ;;  %561 = vmatprep.subr.mxu1 %v251_v53 }
  0x4f   :  { %562 = vmatpush3.msra.mxu1 %v251_v53  ;;  %v673_v53 = vmov 0.0  }
  0x50   :  { %563 = vmatprep.subr.mxu1 %v250_v55 }
  0x51   :  { %564 = vmatpush3.msra.mxu1 %v250_v55 }
  0x52   :  { %594 = vset.pattern.permute.xlu1 %v671_v11  ;;  %565 = vmatprep.subr.mxu1 %v249_v56  ;;  %v117_v11 = vsub.s32 2, %v78_v0 }
  0x53   :  { %215 = vperm.xlu1 %594, %v210_v43   ;;  %566 = vmatpush3.msra.mxu1 %v249_v56 }
  0x54   :  { %v118_v15 = vrot.slane %v65_v4, %v117_v11 }
  0x57   :  { %595 = vset.pattern.permute.xlu1 %v672_v12 }
  0x58   :  { %224 = vperm.xlu1 %595, %v221_v47  }
  0x5c   :  { %596 = vset.pattern.permute.xlu1 %v669_v1  ;;  %v79_v1 = vsub.s32 0, %v78_v0 }
  0x5d   :  { %236 = vperm.xlu1 %596, %v233_v51  }
  0x5e   :  { %v80_v6 = vrot.slane %v65_v4, %v79_v1 }
  0x61   :  { %239 = vperm.xlu1 %596, %v234_v54  }
  0x99   :  { %v93_v57 = vpop.permute.xlu1 %92  ;;  %v109_v58 = vpop.permute.xlu0 %108 }
  0x9a   :  { %v103_v14 = vmul.f32 %v102_v10, %v93_v57  ;;  %v119_v19 = vmul.f32 %v118_v15, %v109_v58 }
  0x9d   :  { %v97_v59 = vpop.permute.xlu1 %96  ;;  %v189_v60 = vpop.permute.xlu0 %188 }
  0x9e   :  { %v104_v30 = vmul.f32 %v102_v10, %v97_v59  ;;  %vm193_vm2 = vcmp.eq.s32.totalorder %v160_v44, %v189_v60  ;;  %v463_v59 = vld [vmem:[%s811_s7] ss:$0 sm:$0xff] }
  0xa2   :  { %v113_v62 = vpop.permute.xlu1 %112  ;;  %v201_v63 = vpop.permute.xlu0 %200 }
  0xa3   :  { %v120_v35 = vmul.f32 %v118_v15, %v113_v62  ;;  %vm205_vm4 = vcmp.eq.s32.totalorder %v160_v44, %v201_v63 }
  0xa7   :  { %v126_v2 = vpop.permute.xlu1 %125  ;;  %v213_v3 = vpop.permute.xlu0 %212 }
  0xa8   :  { %v137_v27 = vmul.f32 %v136_v22, %v126_v2  ;;  %vm217_vm6 = vcmp.eq.s32.totalorder %v160_v44, %v213_v3 }
  0xac   :  { %v70_v8 = vpop.permute.xlu0 %69  ;;  %v177_v9 = vpop.permute.xlu1 %176 }
  0xad   :  { %v81_v12 = vmul.f32 %v80_v6, %v70_v8  ;;  %vm181_vm1 = vcmp.eq.s32.totalorder %v160_v44, %v177_v9 }
  0xaf   :  { %v89_v13 = vadd.f32 %v460_v7, %v81_v12 }
  0xb0   :  { %v75_v18 = vpop.permute.xlu0 %74 }
  0xb1   :  { %v131_v17 = vpop.permute.xlu1 %130  ;;  %v105_v20 = vadd.f32 %v103_v14, %v89_v13  ;;  %v82_v23 = vmul.f32 %v80_v6, %v75_v18 }
  0xb2   :  { %v138_v39 = vmul.f32 %v136_v22, %v131_v17 }
  0xb3   :  { %v121_v26 = vadd.f32 %v119_v19, %v105_v20  ;;  %v90_v28 = vadd.f32 %v460_v7, %v82_v23 }
  0xb4   :  { %v167_v42 = vpop.permute.xlu0 %166 }
  0xb5   :  { %v139_v32 = vadd.f32 %v137_v27, %v121_v26  ;;  %v106_v33 = vadd.f32 %v104_v30, %v90_v28  ;;  %vm171_vm0 = vcmp.eq.s32.totalorder %v160_v44, %v167_v42 }
  0xb6   :  { %v180_v24 = vpop.permute.xlu1 %179  ;;  %vm183_vm3 = vmor %vm171_vm0, %vm181_vm1 }
  0xb7   :  { %v122_v38 = vadd.f32 %v120_v35, %v106_v33  ;;  %vm195_vm5 = vmor %vm183_vm3, %vm193_vm2  ;;  %vm182_vm10 = vcmp.eq.s32.totalorder %v160_v44, %v180_v24 }
  0xb8   :  { %v170_v49 = vpop.permute.xlu0 %169  ;;  %vm207_vm7 = vmor %vm195_vm5, %vm205_vm4 }
  0xb9   :  { %v140_v41 = vadd.f32 %v138_v39, %v122_v38  ;;  %vm172_vm8 = vcmp.eq.s32.totalorder %v160_v44, %v170_v49  ;;  %vm219_vm12 = vmor %vm207_vm7, %vm217_vm6 }
  0xba   :  { %v143_v29 = vpop.permute.xlu1 %142  ;;  %vm184_vm13 = vmor %vm172_vm8, %vm182_vm10 }
  0xbb   :  { %v153_v31 = vmul.f32 %v152_v25, %v143_v29 }
  0xbc   :  { %v228_v52 = vpop.permute.xlu0 %227 }
  0xbd   :  { %v155_v34 = vadd.f32 %v153_v31, %v139_v32  ;;  %vm230_vm6 = vcmp.eq.s32.totalorder %v160_v44, %v228_v52 }
  0xbf   :  { %v192_v36 = vpop.permute.xlu1 %191  ;;  %v157_v37 = vmax.f32 %v155_v34, 0.0 }
  0xc0   :  { %vm194_vm9 = vcmp.eq.s32.totalorder %v160_v44, %v192_v36 }
  0xc1   :  { %532 = vmatprep.mubr.f32.mxu0 %v157_v37  ;;  %vm196_vm15 = vmor %vm184_vm13, %vm194_vm9 }
  0xc4   :  { %v147_v40 = vpop.permute.xlu1 %146 }
  0xc5   :  { %v154_v43 = vmul.f32 %v152_v25, %v147_v40 }
  0xc7   :  { %v156_v45 = vadd.f32 %v154_v43, %v140_v41 }
  0xc9   :  { %v158_v46 = vmax.f32 %v156_v45, 0.0  ;;  %v204_v47 = vpop.permute.xlu1 %203 }
  0xca   :  { %vm206_vm11 = vcmp.eq.s32.totalorder %v160_v44, %v204_v47 }
  0xcb   :  { %533 = vmatmul.mubr.f32.vlgmr.msra.gmra.mxu0 %v158_v46  ;;  %vm208_vm1 = vmor %vm196_vm15, %vm206_vm11 }
  0xce   :  { %v216_v48 = vpop.permute.xlu1 %215 }
  0xcf   :  { %vm218_vm14 = vcmp.eq.s32.totalorder %v160_v44, %v216_v48 }
  0xd0   :  { %vm220_vm2 = vmor %vm208_vm1, %vm218_vm14 }
  0xd1   :  { %vm232_vm7 = vmor %vm220_vm2, %vm230_vm6 }
  0xd3   :  { %v225_v50 = vpop.permute.xlu1 %224 }
  0xd4   :  { %vm229_vm0 = vcmp.eq.s32.totalorder %v160_v44, %v225_v50 }
  0xd5   :  { %vm231_vm3 = vmor %vm219_vm12, %vm229_vm0 }
  0xd8   :  { %v237_v51 = vpop.permute.xlu1 %236 }
  0xd9   :  { %vm241_vm4 = vcmp.eq.s32.totalorder %v160_v44, %v237_v51 }
  0xda   :  { %vm243_vm5 = vmor %vm231_vm3, %vm241_vm4 }
  0xdb   :  { %v461_v54 = vsel %vm243_vm5, 1.0, %v673_v53 }
  0xdc   :  { %567 = vmatprep.mubr.f32.mxu1 %v461_v54  ;;  %v240_v55 = vpop.permute.xlu1 %239 }
  0xdd   :  { %vm242_vm8 = vcmp.eq.s32.totalorder %v160_v44, %v240_v55 }
  0xde   :  { %vm244_vm10 = vmor %vm232_vm7, %vm242_vm8 }
  0xdf   :  { %v462_v56 = vsel %vm244_vm10, 1.0, %v673_v53 }
  0xe0   :  { %568 = vmatmul.mubr.f32.vlgmr.msra.gmra.mxu1 %v462_v56 }
 0x18b   :  { %v534_v57 = vpop.f32.mrf.mxu0 }
 0x18d   :  { %v347_v61 = vpop.f32.mrf.mxu0 }
 0x1a0   :  { %v569_v58 = vpop.f32.mrf.mxu1 }
 0x1a1   :  { %v428_v60 = vadd.f32 %v569_v58, %v534_v57 }
 0x1a2   :  { %v422_v62 = vpop.f32.mrf.mxu1 }
 0x1a3   :  { %v439_v63 = vadd.f32 %v463_v59, %v428_v60  ;;  %v423_v0 = vadd.f32 %v422_v62, %v347_v61 }
 0x1a5   :  { %441 = vst [vmem:[#allocation7 + $0x8] sm:$0xff] %v439_v63  ;;  %v438_v1 = vadd.f32 %v463_v59, %v423_v0 }
 0x1a7   :  { %440 = vst [vmem:[#allocation7] sm:$0xff] %v438_v1 }
 0x1a8   :  { %649 = shalt.err (!%p646_p0)
}
 0x1a9   :  { %453 = dma.vmem_to_hbm [thread:$0]  %s448_s17, 256, %s813_s9, [#allocation4], %s665_s12, %s665_s12, %s666_s13  }
 0x1aa   :  { %662 = dma.done.wait [#allocation4], 256  }
 0x1ab   :  { %663 = vsyncadd [#allocation4], 4294967040 }
 0x1ac   :  { %457 = vsyncpa [#allocation3], 1 }
 0x1ad   :  { %458 = vsyncpa [#allocation6], 1 }
 0x1ae   :  { %459 = vsyncpa [#allocation4], 1 }

</bundles_post_ra>
